<compile_context>
chip_gen: v7x
topology: tpu7x:2x2x1
jax: 0.10.0
libtpu: 0.0.40
codegen_flags: <defaults>
</compile_context>

<pallas_src>
from functools import partial
from typing import Dict, List, Optional

import jax
import jax.numpy as jnp
from jax.experimental import pallas as pl
from jax.experimental.pallas import tpu as pltpu


def _dst_node_type(edge_type: str) -> str:
    """to_dtype_nodes_from_edge(edge, dtype=[Tuple, str])[-1]"""
    return edge_type.split("-")[-1]


def _round_up(x: int, m: int) -> int:
    return ((x + m - 1) // m) * m


def _lane(d: int) -> int:
    return _round_up(max(int(d), 1), 128)


def _vmem_bytes_estimate(n_tile, e_tile, d_in, d_out, d_acc, msg_itemsize):
    """Rough upper bound of the per-step VMEM working set (padded layouts)."""
    est = n_tile * e_tile * 4                           # cached node-id iota
    est += n_tile * e_tile * 6                          # match / one-hot temps
    est += n_tile * _lane(d_acc) * 4                    # scatter-sum accumulator
    est += n_tile * 128 * 4                             # in-degree count
    est += 2 * e_tile * _lane(d_in) * msg_itemsize      # double-buffered msg tiles
    est += 2 * 8 * e_tile * 4                           # double-buffered dst tiles
    est += 2 * _round_up(d_in, 8) * _lane(d_out) * msg_itemsize   # weights
    est += 2 * n_tile * _lane(d_out) * 4                # output tiles
    est += 2 * n_tile * 128 * 4                         # indicator tiles
    return int(est)


# ----------------------------------------------------------------------------
# Fused kernel (per destination node type):
#   grid = (T edge types, node tiles, E tiles [reduction, last])
#   linear (no bias) + scatter-mean over dst, stacked output and per-type
#   presence indicator written in-kernel.
# ----------------------------------------------------------------------------
def _group_scatter_kernel(counts_ref, dst_ref, msg_ref, w_ref,
                          out_ref, ind_ref,
                          acc_ref, cnt_ref, iota_ref,
                          *, premultiply: bool, e_tile: int, n_tile: int,
                          compute_dtype):
    # counts_ref: (T,) int32 SMEM   real edge count per edge type (prefetched)
    # dst_ref:    (1, 1, E_TILE)    destination index per edge, -1 = padding
    # msg_ref:    (1, E_TILE, D_in) edge messages (compute_dtype, zero padded)
    # w_ref:      (1, D_in, D_out)  per-edge-type weight (zero padded rows)
    # out_ref:    (1, N_TILE, D_out) scatter-mean result block
    # ind_ref:    (1, N_TILE, 1)    presence indicator block
    # acc_ref:    (N_TILE, D_acc) f32 running scatter-sum
    # cnt_ref:    (N_TILE, 1) f32    running in-degree count
    # iota_ref:   (N_TILE, E_TILE) int32 cached local node ids
    t = pl.program_id(0)
    n = pl.program_id(1)
    e = pl.program_id(2)

    @pl.when(e == 0)
    def _init():
        acc_ref[...] = jnp.zeros_like(acc_ref)
        cnt_ref[...] = jnp.zeros_like(cnt_ref)
        # Node-id iota is (t, e)-independent: build it once per (t, n) pair
        # instead of every E step (VALU is the binding slot at small d_acc;
        # the reload goes to slack vld slots instead).
        iota_ref[...] = jax.lax.broadcasted_iota(jnp.int32, iota_ref.shape, 0)

    # Skip E tiles that are entirely padding for this edge type.  Padding
    # inside a live tile carries dst = -1 so the one-hot never matches.
    @pl.when(e * e_tile < counts_ref[t])
    def _accumulate():
        dst = dst_ref[0] - n * n_tile                 # (1, E_TILE) local node id
        feats = msg_ref[0]                            # (E_TILE, D_in)
        if premultiply:
            # Scatter the (smaller) D_out features instead of D_in.
            feats = jnp.dot(feats, w_ref[0],
                            preferred_element_type=jnp.float32
                            ).astype(compute_dtype)
        match = iota_ref[...] == dst                  # (N_TILE, E_TILE) bool
        onehot = match.astype(compute_dtype)          # exact in bf16
        # Scatter-sum on the MXU (bf16 in, f32 accumulate); in-degree count on
        # the XLU (lane reduce) so it does not cost an extra MXU pass.
        acc_ref[...] += jnp.dot(onehot, feats,
                                preferred_element_type=jnp.float32)
        cnt_ref[...] += jnp.sum(jnp.where(match, 1.0, 0.0),
                                axis=-1, keepdims=True)

    @pl.when(e == pl.num_programs(2) - 1)
    def _finalize():
        inv = pl.reciprocal(jnp.maximum(cnt_ref[...], 1.0), approx=False)
        mean = acc_ref[...] * inv                     # (N_TILE, D_acc) f32
        if not premultiply:
            # segment_mean(msg) @ W == segment_mean(msg @ W): apply W once.
            mean = jnp.dot(mean.astype(compute_dtype), w_ref[0],
                           preferred_element_type=jnp.float32)
        out_ref[0] = mean.astype(out_ref.dtype)
        # Presence indicator any(mean != 0, axis=-1), emitted here instead of
        # re-reading the whole (N, T, D) slab from HBM in the wrapper.
        nz = jnp.max(jnp.abs(mean), axis=-1, keepdims=True) > 0.0
        ind_ref[0] = nz.astype(jnp.float32)


def fused_group_linear_scatter(messages: List[jnp.ndarray],
                               weights: List[jnp.ndarray],
                               dsts: List[jnp.ndarray],
                               num_nodes: int,
                               d_out: int,
                               *,
                               compute_dtype=jnp.bfloat16,
                               e_tile_cap: int = 2048,
                               n_tile_cap: int = 256):
    """All edge types targeting one node type, fused into a single pallas_call.

    messages[t]: (E_t, D_in_t)   weights[t]: (D_in_t, d_out)   dsts[t]: (E_t,)
    Returns (stacked (T, num_nodes, d_out) scatter-means, (T, num_nodes)
    presence indicators).
    """
    T = len(messages)
    d_in_max = max(int(m.shape[1]) for m in messages)
    e_max = max(int(m.shape[0]) for m in messages)

    # 128-aligned edge tiles / 8-aligned node tiles (caps bound the VMEM
    # working set; larger caps amortize the per-grid-step overhead).
    e_tile = min(_round_up(e_tile_cap, 128), _round_up(max(e_max, 1), 128))
    e_pad = _round_up(max(e_max, 1), e_tile)
    n_tile = min(_round_up(n_tile_cap, 8), _round_up(num_nodes, 8))
    n_pad = _round_up(num_nodes, n_tile)

    # Premultiply only when it actually reduces MXU work given the node tile:
    # msg @ W is re-run once per node tile, so it must save more on the scatter
    # (n_tile * (d_in - d_out)) than it costs (d_in * d_out).
    premultiply = n_tile * (d_in_max - d_out) > d_in_max * d_out
    d_acc = d_out if premultiply else d_in_max

    # Pack per-edge-type slabs with jnp.pad + stack (no .at[].set loop).
    # Messages are streamed in compute_dtype (bf16 halves the only HBM traffic
    # that scales with E); padded edge slots carry dst = -1.
    msg_p = jnp.stack([
        jnp.pad(m.astype(compute_dtype),
                ((0, e_pad - m.shape[0]), (0, d_in_max - m.shape[1])))
        for m in messages])
    dst_p = jnp.stack([
        jnp.pad(d.astype(jnp.int32), (0, e_pad - d.shape[0]),
                constant_values=-1)[None, :]
        for d in dsts])
    w_p = jnp.stack([
        jnp.pad(w.astype(compute_dtype), ((0, d_in_max - w.shape[0]), (0, 0)))
        for w in weights])
    counts = jnp.asarray([int(m.shape[0]) for m in messages], dtype=jnp.int32)

    est = _vmem_bytes_estimate(n_tile, e_tile, d_in_max, d_out, d_acc,
                               jnp.dtype(compute_dtype).itemsize)
    # <= 48 MiB keeps all generations (incl. v7x 64 MiB physical VMEM) safe.
    vmem_limit = int(min(48 * 2**20, max(32 * 2**20, 2 * est)))

    grid = (T, n_pad // n_tile, e_pad // e_tile)
    out, ind = pl.pallas_call(
        partial(_group_scatter_kernel, premultiply=premultiply,
                e_tile=e_tile, n_tile=n_tile, compute_dtype=compute_dtype),
        out_shape=(jax.ShapeDtypeStruct((T, n_pad, d_out), jnp.float32),
                   jax.ShapeDtypeStruct((T, n_pad, 1), jnp.float32)),
        grid_spec=pltpu.PrefetchScalarGridSpec(
            num_scalar_prefetch=1,        # edge counts -> SMEM, drives tile skip
            grid=grid,
            in_specs=[
                # dst: one 128-aligned tile per E step
                pl.BlockSpec((1, 1, e_tile), lambda t, n, e, c: (t, 0, e)),
                # msg: one (E_TILE, D_in) tile per E step (compute_dtype)
                pl.BlockSpec((1, e_tile, d_in_max), lambda t, n, e, c: (t, e, 0)),
                # weight: block index independent of n/e -> VMEM resident per t
                pl.BlockSpec((1, d_in_max, d_out), lambda t, n, e, c: (t, 0, 0)),
            ],
            out_specs=[
                pl.BlockSpec((1, n_tile, d_out), lambda t, n, e, c: (t, n, 0)),
                pl.BlockSpec((1, n_tile, 1), lambda t, n, e, c: (t, n, 0)),
            ],
            scratch_shapes=[
                pltpu.VMEM((n_tile, d_acc), jnp.float32),   # scatter-sum acc
                pltpu.VMEM((n_tile, 1), jnp.float32),       # in-degree count
                pltpu.VMEM((n_tile, e_tile), jnp.int32),    # cached node-id iota
            ],
        ),
        compiler_params=pltpu.CompilerParams(
            # t, n independent (megacore-shardable); E is the sequential
            # reduction.  TODO(synk): pltpu.CORE_PARALLEL on t/n for explicit
            # 2-TC sharding on v7x (re-validate per-core scratch first).
            dimension_semantics=("parallel", "parallel", "arbitrary"),
            vmem_limit_bytes=vmem_limit,
        ),
    )(counts, dst_p, msg_p, w_p)
    # TODO(synk): padding d_out to 128 lanes in-kernel (lane-dense stores) was
    # skipped: it multiplies output HBM write traffic at small d_out.
    return out[:, :num_nodes], ind[:, :num_nodes, 0]


# ----------------------------------------------------------------------------
# Module-level wrapper (glue in plain JAX)
# ----------------------------------------------------------------------------
class ElementLevelScatterModuleDictPallas:
    def __init__(self,
                 message_dims: Dict[str, int],
                 node_dims: Dict[str, int],
                 key: jax.Array,
                 compute_dtype=jnp.bfloat16,
                 e_tile_cap: int = 2048,
                 n_tile_cap: int = 256):
        # All irreps are scalar-only ("Nx0e"), so each LinearRS is a dense
        # linear without bias, weights rescaled by 1/sqrt(fan_in).
        # TODO(synk): general (non-scalar) irreps would need a block-diagonal
        # equivariant linear; not represented here.
        self.message_dims = message_dims
        self.node_dims = node_dims
        self.compute_dtype = compute_dtype
        self.e_tile_cap = e_tile_cap
        self.n_tile_cap = n_tile_cap
        self.weights: Dict[str, jnp.ndarray] = {}
        for i, (etype, d_in) in enumerate(sorted(message_dims.items())):
            d_out = node_dims[_dst_node_type(etype)]
            k = jax.random.fold_in(key, i)
            w = jax.random.normal(k, (d_in, d_out), dtype=jnp.float32)
            self.weights[etype] = w / jnp.sqrt(jnp.float32(d_in))

    def __call__(self,
                 message_dict: Dict[str, jnp.ndarray],
                 edge_index_dict: Dict[str, jnp.ndarray],
                 num_nodes_dict: Dict[str, int],
                 compute_dtype: Optional[object] = None):
        if compute_dtype is None:
            compute_dtype = self.compute_dtype
        # Group edge types by destination node type (insertion order preserved,
        # matching the PyTorch loop over message_dict).
        groups: Dict[str, List[str]] = {}
        for etype in message_dict:
            groups.setdefault(_dst_node_type(etype), []).append(etype)

        out_dict: Dict[str, jnp.ndarray] = {}
        num_types_dict: Dict[str, jnp.ndarray] = {}
        # Node types with no incoming edge type are skipped (torch.stack([])
        # would raise in the reference module as well).
        for nt, etypes in groups.items():
            msgs = [message_dict[e] for e in etypes]
            ws = [self.weights[e] for e in etypes]
            dsts = [edge_index_dict[e][1] for e in etypes]   # row 1 = dst
            stacked, ind = fused_group_linear_scatter(
                msgs, ws, dsts, num_nodes_dict[nt], self.node_dims[nt],
                compute_dtype=compute_dtype,
                e_tile_cap=self.e_tile_cap, n_tile_cap=self.n_tile_cap)
            out_dict[nt] = jnp.transpose(stacked, (1, 0, 2))  # (N, T, D_out)
            num_types_dict[nt] = jnp.sum(ind, axis=0)         # (N,)
        return out_dict, num_types_dict


# ----------------------------------------------------------------------------
# Pure-JAX reference for validation (mirrors the PyTorch op order exactly)
# ----------------------------------------------------------------------------
def _reference(module, message_dict, edge_index_dict, num_nodes_dict):
    out_lists = {nt: [] for nt in num_nodes_dict}
    cnt_lists = {nt: [] for nt in num_nodes_dict}
    for etype, msg in message_dict.items():
        nt = _dst_node_type(etype)
        n = num_nodes_dict[nt]
        y = msg @ module.weights[etype]
        dst = edge_index_dict[etype][1]
        summed = jax.ops.segment_sum(y, dst, num_segments=n)
        count = jax.ops.segment_sum(jnp.ones((y.shape[0],)), dst, num_segments=n)
        mean = summed / jnp.maximum(count, 1.0)[:, None]
        out_lists[nt].append(mean)
        cnt_lists[nt].append(jnp.any(mean != 0.0, axis=-1).astype(jnp.float32))
    out_dict = {nt: jnp.stack(v, axis=1) for nt, v in out_lists.items() if v}
    num_types_dict = {nt: jnp.sum(jnp.stack(v, axis=1), axis=1)
                      for nt, v in cnt_lists.items() if v}
    return out_dict, num_types_dict


if __name__ == "__main__":
    key = jax.random.PRNGKey(0)

    # Node types and their feature dims (irreps_node_dict, scalar-only).
    node_dims = {"6": 32, "8": 8}
    num_nodes_dict = {"6": 70, "8": 61}

    # Edge types and their message dims (irreps_message_dict, scalar-only).
    message_dims = {"6-6": 24, "8-6": 16, "6-8": 24}
    num_edges = {"6-6": 300, "8-6": 77, "6-8": 160}

    kw, km, ke = jax.random.split(key, 3)
    # Small tile caps so the demo exercises multiple E tiles (with the
    # tile-skip path for the 77-edge type), multiple node tiles, node/edge
    # padding, and both premultiply branches.
    module = ElementLevelScatterModuleDictPallas(
        message_dims, node_dims, kw,
        compute_dtype=jnp.bfloat16, e_tile_cap=128, n_tile_cap=48)

    message_dict = {}
    edge_index_dict = {}
    for i, etype in enumerate(sorted(message_dims)):
        src_t, dst_t = etype.split("-")
        e = num_edges[etype]
        message_dict[etype] = jax.random.normal(
            jax.random.fold_in(km, i), (e, message_dims[etype]), dtype=jnp.float32)
        src_idx = jax.random.randint(
            jax.random.fold_in(ke, 2 * i), (e,), 0, num_nodes_dict[src_t], dtype=jnp.int32)
        dst_idx = jax.random.randint(
            jax.random.fold_in(ke, 2 * i + 1), (e,), 0, num_nodes_dict[dst_t], dtype=jnp.int32)
        edge_index_dict[etype] = jnp.stack([src_idx, dst_idx], axis=0)  # (2, E)

    ref_out, ref_cnt = _reference(module, message_dict, edge_index_dict, num_nodes_dict)

    # Fast path: bf16 MXU matmuls + bf16 message stream.
    out_bf16, cnt_bf16 = module(message_dict, edge_index_dict, num_nodes_dict)
    jax.block_until_ready(out_bf16)
    jax.block_until_ready(cnt_bf16)

    # Precise path: same kernel structure in f32, tight tolerance.
    out_f32, cnt_f32 = module(message_dict, edge_index_dict, num_nodes_dict,
                              compute_dtype=jnp.float32)
    jax.block_until_ready(out_f32)
    jax.block_until_ready(cnt_f32)

    for nt in num_nodes_dict:
        n_etypes = sum(1 for k in message_dims if _dst_node_type(k) == nt)
        expect = (num_nodes_dict[nt], n_etypes, node_dims[nt])
        assert out_bf16[nt].shape == expect, (nt, out_bf16[nt].shape)
        assert cnt_bf16[nt].shape == (num_nodes_dict[nt],)
        assert jnp.allclose(out_f32[nt], ref_out[nt], atol=1e-4, rtol=1e-4), nt
        assert jnp.allclose(cnt_f32[nt], ref_cnt[nt], atol=1e-6), nt
        assert jnp.allclose(out_bf16[nt], ref_out[nt], atol=5e-2, rtol=5e-2), nt
        assert jnp.allclose(cnt_bf16[nt], ref_cnt[nt], atol=1e-6), nt

    print("KERNEL_OK")
</pallas_src>

<mosaic_0001>
module attributes {stable_mosaic.version = 11 : i64} {
  func.func @_group_scatter_kernel(%arg0: i32, %arg1: i32, %arg2: i32, %arg3: memref<2xi32, #tpu.memory_space<smem>>, %arg4: memref<1x1x128xi32, #tpu.memory_space<vmem>>, %arg5: memref<1x128x24xbf16, #tpu.memory_space<vmem>>, %arg6: memref<1x24x32xbf16, #tpu.memory_space<vmem>>, %arg7: memref<1x48x32xf32, #tpu.memory_space<vmem>>, %arg8: memref<1x48x1xf32, #tpu.memory_space<vmem>>, %arg9: memref<48x24xf32, #tpu.memory_space<vmem>>, %arg10: memref<48x1xf32, #tpu.memory_space<vmem>>, %arg11: memref<48x128xi32, #tpu.memory_space<vmem>>) attributes {dimension_semantics = [#tpu.dimension_semantics<parallel>, #tpu.dimension_semantics<parallel>, #tpu.dimension_semantics<arbitrary>], iteration_bounds = array<i64: 2, 2, 3>, scalar_prefetch = 1 : i64, scratch_operands = 3 : i64, tpu.core_type = #tpu.core_type<tc>, window_params = [{transform_indices = @transform_0, window_bounds = array<i64: 1, 1, 128>}, {transform_indices = @transform_1, window_bounds = array<i64: 1, 128, 24>}, {transform_indices = @transform_2, window_bounds = array<i64: 1, 24, 32>}, {transform_indices = @transform_3, window_bounds = array<i64: 1, 48, 32>}, {transform_indices = @transform_4, window_bounds = array<i64: 1, 48, 1>}]} {
    %c0_i32 = arith.constant 0 : i32
    %0 = arith.cmpi eq, %arg2, %c0_i32 : i32
    %1 = arith.extui %0 : i1 to i32
    %c0_i32_0 = arith.constant 0 : i32
    %2 = arith.cmpi ne, %1, %c0_i32_0 : i32
    scf.if %2 {
      %cst = arith.constant 0.000000e+00 : f32
      %12 = vector.broadcast %cst : f32 to vector<48x24xf32>
      %c0 = arith.constant 0 : index
      %c0_3 = arith.constant 0 : index
      %13 = vector.load %arg9[%c0, %c0_3] : memref<48x24xf32, #tpu.memory_space<vmem>>, vector<48x24xf32>
      tpu.vector_store %arg9[%c0, %c0_3], %12 {strides = array<i32>} : memref<48x24xf32, #tpu.memory_space<vmem>>, vector<48x24xf32>,
      %cst_4 = arith.constant 0.000000e+00 : f32
      %14 = vector.broadcast %cst_4 : f32 to vector<48x1xf32>
      %c0_5 = arith.constant 0 : index
      %c0_6 = arith.constant 0 : index
      %15 = vector.load %arg10[%c0_5, %c0_6] : memref<48x1xf32, #tpu.memory_space<vmem>>, vector<48x1xf32>
      tpu.vector_store %arg10[%c0_5, %c0_6], %14 {strides = array<i32>} : memref<48x1xf32, #tpu.memory_space<vmem>>, vector<48x1xf32>,
      %16 = tpu.iota {dimensions = array<i32: 0>} : vector<48x128xi32>
      %c0_7 = arith.constant 0 : index
      %c0_8 = arith.constant 0 : index
      %17 = vector.load %arg11[%c0_7, %c0_8] : memref<48x128xi32, #tpu.memory_space<vmem>>, vector<48x128xi32>
      tpu.vector_store %arg11[%c0_7, %c0_8], %16 {strides = array<i32>} : memref<48x128xi32, #tpu.memory_space<vmem>>, vector<48x128xi32>,
    } else {
    }
    %c128_i32 = arith.constant 128 : i32
    %3 = arith.muli %arg2, %c128_i32 : i32
    %4 = arith.index_cast %arg0 : i32 to index
    %5 = memref.load %arg3[%4] : memref<2xi32, #tpu.memory_space<smem>>
    %6 = arith.cmpi slt, %3, %5 : i32
    %7 = arith.extui %6 : i1 to i32
    %c0_i32_1 = arith.constant 0 : i32
    %8 = arith.cmpi ne, %7, %c0_i32_1 : i32
    scf.if %8 {
      %c0 = arith.constant 0 : index
      %c0_3 = arith.constant 0 : index
      %c0_4 = arith.constant 0 : index
      %12 = vector.load %arg4[%c0, %c0_3, %c0_4] : memref<1x1x128xi32, #tpu.memory_space<vmem>>, vector<1x1x128xi32>
      %13 = vector.shape_cast %12 : vector<1x1x128xi32> to vector<1x128xi32>
      %c48_i32 = arith.constant 48 : i32
      %14 = arith.muli %arg1, %c48_i32 : i32
      %15 = vector.broadcast %14 : i32 to vector<1x128xi32>
      %16 = arith.subi %13, %15 : vector<1x128xi32>
      %c0_5 = arith.constant 0 : index
      %c0_6 = arith.constant 0 : index
      %c0_7 = arith.constant 0 : index
      %17 = vector.load %arg5[%c0_5, %c0_6, %c0_7] : memref<1x128x24xbf16, #tpu.memory_space<vmem>>, vector<1x128x24xbf16>
      %18 = vector.shape_cast %17 : vector<1x128x24xbf16> to vector<128x24xbf16>
      %c0_8 = arith.constant 0 : index
      %c0_9 = arith.constant 0 : index
      %19 = vector.load %arg11[%c0_8, %c0_9] : memref<48x128xi32, #tpu.memory_space<vmem>>, vector<48x128xi32>
      %20 = vector.broadcast %16 : vector<1x128xi32> to vector<48x128xi32>
      %21 = arith.cmpi eq, %19, %20 : vector<48x128xi32>
      %22 = arith.extui %21 : vector<48x128xi1> to vector<48x128xi32>
      %23 = arith.sitofp %22 : vector<48x128xi32> to vector<48x128xf32>
      %24 = arith.truncf %23 : vector<48x128xf32> to vector<48x128xbf16>
      %c0_10 = arith.constant 0 : index
      %c0_11 = arith.constant 0 : index
      %25 = vector.load %arg9[%c0_10, %c0_11] : memref<48x24xf32, #tpu.memory_space<vmem>>, vector<48x24xf32>
      %cst = arith.constant dense<0.000000e+00> : vector<48x24xf32>
      %26 = tpu.matmul %24, %18, %cst {dimension_numbers = #tpu.dot_dimension_numbers<[1], [0], [0], [1], [0, 0, 1, 1], [], []>} : vector<48x128xbf16>, vector<128x24xbf16>, vector<48x24xf32> -> vector<48x24xf32>
      %27 = arith.addf %25, %26 : vector<48x24xf32>
      %c0_12 = arith.constant 0 : index
      %c0_13 = arith.constant 0 : index
      %28 = vector.load %arg9[%c0_12, %c0_13] : memref<48x24xf32, #tpu.memory_space<vmem>>, vector<48x24xf32>
      tpu.vector_store %arg9[%c0_12, %c0_13], %27 {strides = array<i32>} : memref<48x24xf32, #tpu.memory_space<vmem>>, vector<48x24xf32>,
      %c0_14 = arith.constant 0 : index
      %c0_15 = arith.constant 0 : index
      %29 = vector.load %arg10[%c0_14, %c0_15] : memref<48x1xf32, #tpu.memory_space<vmem>>, vector<48x1xf32>
      %cst_16 = arith.constant 1.000000e+00 : f32
      %cst_17 = arith.constant 0.000000e+00 : f32
      %30 = vector.broadcast %cst_16 : f32 to vector<48x128xf32>
      %31 = vector.broadcast %cst_17 : f32 to vector<48x128xf32>
      %32 = arith.select %21, %30, %31 : vector<48x128xi1>, vector<48x128xf32>
      %cst_18 = arith.constant dense<0.000000e+00> : vector<48xf32>
      %33 = vector.multi_reduction <add>, %32, %cst_18 [1] : vector<48x128xf32> to vector<48xf32>
      %34 = vector.shape_cast %33 : vector<48xf32> to vector<48x1xf32>
      %35 = arith.addf %29, %34 : vector<48x1xf32>
      %c0_19 = arith.constant 0 : index
      %c0_20 = arith.constant 0 : index
      %36 = vector.load %arg10[%c0_19, %c0_20] : memref<48x1xf32, #tpu.memory_space<vmem>>, vector<48x1xf32>
      tpu.vector_store %arg10[%c0_19, %c0_20], %35 {strides = array<i32>} : memref<48x1xf32, #tpu.memory_space<vmem>>, vector<48x1xf32>,
    } else {
    }
    %c2_i32 = arith.constant 2 : i32
    %9 = arith.cmpi eq, %arg2, %c2_i32 : i32
    %10 = arith.extui %9 : i1 to i32
    %c0_i32_2 = arith.constant 0 : i32
    %11 = arith.cmpi ne, %10, %c0_i32_2 : i32
    scf.if %11 {
      %c0 = arith.constant 0 : index
      %c0_3 = arith.constant 0 : index
      %12 = vector.load %arg10[%c0, %c0_3] : memref<48x1xf32, #tpu.memory_space<vmem>>, vector<48x1xf32>
      %cst = arith.constant 1.000000e+00 : f32
      %13 = vector.broadcast %cst : f32 to vector<48x1xf32>
      %14 = arith.maximumf %12, %13 : vector<48x1xf32>
      %15 = tpu.reciprocal %14 : vector<48x1xf32> -> vector<48x1xf32>
      %c0_4 = arith.constant 0 : index
      %c0_5 = arith.constant 0 : index
      %16 = vector.load %arg9[%c0_4, %c0_5] : memref<48x24xf32, #tpu.memory_space<vmem>>, vector<48x24xf32>
      %17 = vector.broadcast %15 : vector<48x1xf32> to vector<48x24xf32>
      %18 = arith.mulf %16, %17 : vector<48x24xf32>
      %19 = arith.truncf %18 : vector<48x24xf32> to vector<48x24xbf16>
      %c0_6 = arith.constant 0 : index
      %c0_7 = arith.constant 0 : index
      %c0_8 = arith.constant 0 : index
      %20 = vector.load %arg6[%c0_6, %c0_7, %c0_8] : memref<1x24x32xbf16, #tpu.memory_space<vmem>>, vector<1x24x32xbf16>
      %21 = vector.shape_cast %20 : vector<1x24x32xbf16> to vector<24x32xbf16>
      %cst_9 = arith.constant dense<0.000000e+00> : vector<48x32xf32>
      %22 = tpu.matmul %19, %21, %cst_9 {dimension_numbers = #tpu.dot_dimension_numbers<[1], [0], [0], [1], [0, 0, 1, 1], [], []>} : vector<48x24xbf16>, vector<24x32xbf16>, vector<48x32xf32> -> vector<48x32xf32>
      %c0_10 = arith.constant 0 : index
      %c0_11 = arith.constant 0 : index
      %c0_12 = arith.constant 0 : index
      %23 = vector.load %arg7[%c0_10, %c0_11, %c0_12] : memref<1x48x32xf32, #tpu.memory_space<vmem>>, vector<1x48x32xf32>
      %24 = vector.shape_cast %23 : vector<1x48x32xf32> to vector<48x32xf32>
      %25 = vector.shape_cast %22 : vector<48x32xf32> to vector<1x48x32xf32>
      tpu.vector_store %arg7[%c0_10, %c0_11, %c0_12], %25 {strides = array<i32>} : memref<1x48x32xf32, #tpu.memory_space<vmem>>, vector<1x48x32xf32>,
      %26 = math.absf %22 : vector<48x32xf32>
      %cst_13 = arith.constant dense<0xFF800000> : vector<48xf32>
      %27 = vector.multi_reduction <maximumf>, %26, %cst_13 [1] : vector<48x32xf32> to vector<48xf32>
      %28 = vector.shape_cast %27 : vector<48xf32> to vector<48x1xf32>
      %cst_14 = arith.constant 0.000000e+00 : f32
      %29 = vector.broadcast %cst_14 : f32 to vector<48x1xf32>
      %30 = arith.cmpf ogt, %28, %29 : vector<48x1xf32>
      %31 = arith.extui %30 : vector<48x1xi1> to vector<48x1xi32>
      %32 = arith.sitofp %31 : vector<48x1xi32> to vector<48x1xf32>
      %c0_15 = arith.constant 0 : index
      %c0_16 = arith.constant 0 : index
      %c0_17 = arith.constant 0 : index
      %33 = vector.load %arg8[%c0_15, %c0_16, %c0_17] : memref<1x48x1xf32, #tpu.memory_space<vmem>>, vector<1x48x1xf32>
      %34 = vector.shape_cast %33 : vector<1x48x1xf32> to vector<48x1xf32>
      %35 = vector.shape_cast %32 : vector<48x1xf32> to vector<1x48x1xf32>
      tpu.vector_store %arg8[%c0_15, %c0_16, %c0_17], %35 {strides = array<i32>} : memref<1x48x1xf32, #tpu.memory_space<vmem>>, vector<1x48x1xf32>,
    } else {
    }
    return
  }
  func.func @transform_0(%arg0: i32, %arg1: i32, %arg2: i32, %arg3: memref<2xi32, #tpu.memory_space<smem>>) -> (i32, i32, i32) {
    %c0_i32 = arith.constant 0 : i32
    %c0_i32_0 = arith.constant 0 : i32
    return %arg0, %c0_i32, %arg2 : i32, i32, i32
  }
  func.func @transform_1(%arg0: i32, %arg1: i32, %arg2: i32, %arg3: memref<2xi32, #tpu.memory_space<smem>>) -> (i32, i32, i32) {
    %c0_i32 = arith.constant 0 : i32
    %c0_i32_0 = arith.constant 0 : i32
    return %arg0, %arg2, %c0_i32 : i32, i32, i32
  }
  func.func @transform_2(%arg0: i32, %arg1: i32, %arg2: i32, %arg3: memref<2xi32, #tpu.memory_space<smem>>) -> (i32, i32, i32) {
    %c0_i32 = arith.constant 0 : i32
    %c0_i32_0 = arith.constant 0 : i32
    %c0_i32_1 = arith.constant 0 : i32
    return %arg0, %c0_i32, %c0_i32_0 : i32, i32, i32
  }
  func.func @transform_3(%arg0: i32, %arg1: i32, %arg2: i32, %arg3: memref<2xi32, #tpu.memory_space<smem>>) -> (i32, i32, i32) {
    %c0_i32 = arith.constant 0 : i32
    %c0_i32_0 = arith.constant 0 : i32
    return %arg0, %arg1, %c0_i32 : i32, i32, i32
  }
  func.func @transform_4(%arg0: i32, %arg1: i32, %arg2: i32, %arg3: memref<2xi32, #tpu.memory_space<smem>>) -> (i32, i32, i32) {
    %c0_i32 = arith.constant 0 : i32
    %c0_i32_0 = arith.constant 0 : i32
    return %arg0, %arg1, %c0_i32 : i32, i32, i32
  }
}

</mosaic_0001>

<bundles_post_ra>
// kernel: tpu_custom_call.1
= control target key start
LH: loop header
LB: loop body
LE: loop exit
PB: predicated region body
PF: predicated region fallthrough
CT: control target
= control target key end

     0   :  { %s1500_s0 = inlined_call_operand.vmem [shape: s32[2], index: 0, kind: input, shape index: {}]   ;;  %s1501_s1 = inlined_call_operand.vmem [shape: s32[2,1,384], index: 1, kind: input, shape index: {}]   ;;  %s1502_s2 = inlined_call_operand.vmem [shape: bf16[2,384,24], index: 2, kind: input, shape index: {}]   ;;  %s1503_s3 = inlined_call_operand.vmem [shape: bf16[2,24,32], index: 3, kind: input, shape index: {}]   ;;  %s1504_s4 = inlined_call_operand.vmem [shape: f32[2,96,32], index: 4, kind: output, shape index: {0}]   ;;  %s1505_s5 = inlined_call_operand.vmem [shape: f32[2,96,1], index: 5, kind: output, shape index: {1}]  }
   0x1   :  { %s11_s20 = sshll.u32 %s1500_s0, 4  ;;  %s12_s20 = int_to_ptr.vmem [resolvable:$true] %s11_s20 }
   0x2   :  { %s1170_s21 = scalar_lea.vmem %s12_s20, 16  ;;  %p1175_p1 = scmp.lt.s32.totalorder %s12_s20, %s12_s20 }
   0x3   :  { %p1171_p0 = scmp.ne.s32.totalorder %s12_s20, %s1170_s21  ;;  %p1176_p2 = scmp.lt.s32.totalorder %s1170_s21, %s1170_s21 }
   0x5   :  { %p1177_p3 = por %p1176_p2, %p1175_p1 }
   0x7   :  { %p1178_p4 = pnand %p1177_p3, %p1171_p0 }
   0x9   :  { %1181 = shalt.err (!%p1178_p4)  }
   0xa   :  { %s1240_s22 = smov [#allocation6]  }
   0xb   :  { %14 = dma.vmem_to_smem %s12_s20, 16, %s1240_s22, [#allocation5] }
   0xc   :  { %1210 = dma.done.wait [#allocation5], 16 }
   0xd   :  { %1211 = vsyncadd [#allocation5], 4294967280 }
   0xe   :  { %16 = sfence }
   0xf   :  { %s1281_s23 = smov 0   ;;  %s1283_s24 = smov 0  }
  0x10   :  { %s1285_s25 = smov 0   ;;  %s1287_s0 = smov 0  }
  0x11   :  { %s1289_s26 = smov 0   ;;  %s1291_s27 = smov 0  }
  0x12   :  { %s1293_s28 = smov 0  }
  0x13 LB: > { %s34_s29 = sadd.s32 1, %s1226_s0  ;;  %s37_s30 = sadd.s32 1, %s1230_s26  ;;  %s1238_s28 = sphi %s1293_s28, %s22_s28   ;;  %s1234_s27 = sphi %s1291_s27, %s1518_s27   ;;  %s1230_s26 = sphi %s1289_s26, %s1517_s26   ;;  %s1226_s0 = sphi %s1287_s0, %s1516_s0   ;;  %s1222_s25 = sphi %s1285_s25, %s1515_s25   ;;  %s1218_s24 = sphi %s1283_s24, %s1514_s24   ;;  %s1214_s23 = sphi %s1281_s23, %s1513_s23  }
  0x14   : > { %p35_p5 = scmp.ge.s32.totalorder %s34_s29, 3  ;;  %p956_p6 = scmp.ge.s32.totalorder %s1238_s28, 1 }
  0x15   : > { %p226_p7 = scmp.lt.s32.totalorder %s1238_s28, 13  ;;  %s41_s6 = sadd.s32 1, %s1234_s27 }
  0x16   : > { %s1520_s29 = smov (%p35_p5, %s34_s29), 0  ;;  %s1522_s30 = smov (!%p35_p5, %s37_s30), %s1230_s26 }
  0x17   : > { %1506 = sst [smem:[#allocation8_spill]] %s1520_s29  ;;  %p227_p8 = pnand %p956_p6, %p226_p7 }
  0x18   : > { %p39_p9 = scmp.ge.s32.totalorder %s1522_s30, 2  ;;  %p281_p11 = scmp.lt.s32.totalorder (!%p227_p8), %s1222_s25, 1 }
  0x19   : > { %230 = sbr.rel (%p227_p8) target bundleno = 833 (0x341), region = 32  ;;  %p283_p12 = scmp.lt.s32.totalorder (!%p227_p8), %s1214_s23, 2 }
  0x1a   : > { %s1524_s30 = smov (%p39_p9, %s1522_s30), 0  ;;  %s1526_s6 = smov (!%p39_p9, %s41_s6), %s1234_s27 }
  0x1b   : > { %1507 = sst [smem:[#allocation9_spill]] %s1524_s30  ;;  %p43_p10 = scmp.ge.s32.totalorder %s1526_s6, 2 }
  0x1c   : > { %s957_s7 = sshll.u32 (!%p227_p8), %s1214_s23, 4  ;;  %s303_s11 = smul.u32 (!%p227_p8), 6, %s1218_s24 }
  0x1d   : > { %s1528_s6 = smov (%p43_p10, %s1526_s6), 0  ;;  %p291_p13 = scmp.lt.s32.totalorder (!%p227_p8), %s957_s7, 47 }
  0x1e   : > { %1508 = sst [smem:[#allocation10_spill]] %s1528_s6  ;;  %p306_p0 = scmp.lt.s32.totalorder (!%p227_p8), %s303_s11, 11 }
  0x1f   : > { %p962_p1 = scmp.ne.s32.totalorder (!%p227_p8), %s1214_s23, 0 }
  0x20   : > { %s282_s8 = scalar_select %p281_p11, %s1222_s25, 1 }
  0x21   : > { %s284_s9 = scalar_select %p283_p12, %s1214_s23, 2 }
  0x22   : > { %s1079_s10 = smul.u32 3, %s282_s8  ;;  %s1530_s7 = smov (!%p291_p13, %s957_s7), 47  ;;  %vm328_vm0 = vcmask (!%p962_p1), 195584   ;;  %vm335_vm1 = vcmask (!%p962_p1), 7168   ;;  %v342_v0 = vlaneseq (!%p962_p1)  ;;  %v1241_v1 = vmov (!%p962_p1), 0.0  }
  0x23   : > { %s1080_s13 = smul.u32 48, %s282_s8  ;;  %s1532_s11 = smov (!%p306_p0, %s303_s11), 11  ;;  %329 = vst.msk [vmem:[#allocation2] sm:$0xff] (!%p962_p1), %vm328_vm0, %v1241_v1  ;;  %330 = vst.msk [vmem:[#allocation2 + $0x8] sm:$0xff] (!%p962_p1), %vm328_vm0, %v1241_v1 }
  0x24   : > { %s1335_s12 = sadd.s32 %s1079_s10, %s284_s9  ;;  %s1081_s17 = smul.u32 12, %s282_s8  ;;  %331 = vst.msk [vmem:[#allocation2 + $0x10] sm:$0xff] (!%p962_p1), %vm328_vm0, %v1241_v1  ;;  %332 = vst.msk [vmem:[#allocation2 + $0x18] sm:$0xff] (!%p962_p1), %vm328_vm0, %v1241_v1  ;;  %v343_v2 = vshrl.u32 (!%p962_p1), %v342_v0, 7 }
  0x25   : > { %s294_s21 = sadd.s32 %s1080_s13, %s1530_s7  ;;  %327 = sbr.rel (%p962_p1) target bundleno = 44 (0x2c), region = 36  ;;  %333 = vst.msk [vmem:[#allocation2 + $0x20] sm:$0xff] (!%p962_p1), %vm328_vm0, %v1241_v1  ;;  %334 = vst.msk [vmem:[#allocation2 + $0x28] sm:$0xff] (!%p962_p1), %vm328_vm0, %v1241_v1 }
  0x26   : > { %s1344_s20 = scalar_lea.vmem %s1503_s3, %s1081_s17  ;;  %s958_s22 = sshll.u32 %s294_s21, 2  ;;  %336 = vst.msk [vmem:[#allocation3] sm:$0xff] (!%p962_p1), %vm335_vm1, %v1241_v1  ;;  %337 = vst.msk [vmem:[#allocation3 + $0x8] sm:$0xff] (!%p962_p1), %vm335_vm1, %v1241_v1  ;;  %v344_v3 = vadd.s32 (!%p962_p1), 8, %v343_v2  ;;  %v345_v4 = vadd.s32 (!%p962_p1), 16, %v343_v2  ;;  %v346_v5 = vadd.s32 (!%p962_p1), 24, %v343_v2 }
  0x27   : > { %s1349_s9 = scalar_lea.vmem %s1502_s2, %s958_s22  ;;  %s309_s10 = sadd.s32 %s1081_s17, %s1532_s11  ;;  %338 = vst.msk [vmem:[#allocation3 + $0x10] sm:$0xff] (!%p962_p1), %vm335_vm1, %v1241_v1  ;;  %339 = vst.msk [vmem:[#allocation3 + $0x18] sm:$0xff] (!%p962_p1), %vm335_vm1, %v1241_v1  ;;  %v347_v6 = vadd.s32 (!%p962_p1), 32, %v343_v2  ;;  %v348_v7 = vadd.s32 (!%p962_p1), 40, %v343_v2 }
  0x28   : > { %s960_s29 = sshll.u32 %s309_s10, 3  ;;  %340 = vst.msk [vmem:[#allocation3 + $0x20] sm:$0xff] (!%p962_p1), %vm335_vm1, %v1241_v1  ;;  %341 = vst.msk [vmem:[#allocation3 + $0x28] sm:$0xff] (!%p962_p1), %vm335_vm1, %v1241_v1 }
  0x29   : > { %s1354_s8 = scalar_lea.vmem %s1504_s4, %s960_s29  ;;  %s1359_s19 = scalar_lea.vmem %s1505_s5, %s960_s29  ;;  %349 = vst [vmem:[#allocation4] sm:$0xff] (!%p962_p1), %v343_v2  ;;  %350 = vst [vmem:[#allocation4 + $0x8] sm:$0xff] (!%p962_p1), %v344_v3 }
  0x2a   : > { %351 = vst [vmem:[#allocation4 + $0x10] sm:$0xff] (!%p962_p1), %v345_v4  ;;  %352 = vst [vmem:[#allocation4 + $0x18] sm:$0xff] (!%p962_p1), %v346_v5 }
  0x2b   : > { %353 = vst [vmem:[#allocation4 + $0x20] sm:$0xff] (!%p962_p1), %v347_v6  ;;  %354 = vst [vmem:[#allocation4 + $0x28] sm:$0xff] (!%p962_p1), %v348_v7 }
  0x2c PF: > { %s963_s29 = sshll.u32 %s1214_s23, 7  ;;  %s356_s30 = sld [smem:[#allocation6 + %s1222_s25]] }
  0x32   : > { %p964_p2 = scmp.ge.s32.totalorder %s963_s29, %s356_s30 }
  0x33   : > { %v1146_v8 = vld [vmem:[%s1349_s9] sm:$0xff] (!%p964_p2)   ;;  %v387_v9 = vlaneseq (!%p964_p2)  ;;  %v1242_v10 = vmov (!%p964_p2), 0.0   ;;  %v1147_v11 = vld [vmem:[%s1349_s9 + $0x8] sm:$0xff] (!%p964_p2)   ;;  %s362_s6 = smul.u32 (!%p964_p2), 48, %s1218_s24  ;;  %vm1243_vm2 = vmmov (!%p964_p2), 0   ;;  %v1148_v13 = vld [vmem:[%s1349_s9 + $0x10] sm:$0xff] (!%p964_p2)   ;;  %s1509_s7 = scalar_lea.vmem (!%p964_p2), %s1501_s1, %s1335_s12 }
  0x34   : > { %360 = sbr.rel (%p964_p2) target bundleno = 309 (0x135), region = 40  ;;  %1059 = vmatprep.subr.bf16.mxu1 (!%p964_p2), %v1242_v10  ;;  %1015 = vmatprep.subr.bf16.mxu0 (!%p964_p2), %v1242_v10  ;;  %v361_v16 = vld [vmem:[%s1509_s7] sm:$0x1] (!%p964_p2)  ;;  %v1149_v18 = vld [vmem:[%s1349_s9 + $0x18] sm:$0xff] (!%p964_p2)   ;;  %v383_v19 = vld [vmem:[#allocation4 + $0x10] sm:$0xff] (!%p964_p2)  ;;  %vm566_vm12 = vcmask (!%p964_p2), 7168  }
  0x35   : > { %1067 = vmatpush3.bf16.msra.mxu1 (!%p964_p2), %v1146_v8  ;;  %1016 = vmatpush3.bf16.msra.mxu0 (!%p964_p2), %v1146_v8  ;;  %v388_v12 = vshrl.u32 (!%p964_p2), %v387_v9, 7  ;;  %v363_v14 = vstv (!%p964_p2), %s362_s6  ;;  %v381_v20 = vld [vmem:[#allocation4] sm:$0xff] (!%p964_p2)  ;;  %v384_v22 = vld [vmem:[#allocation4 + $0x18] sm:$0xff] (!%p964_p2)  ;;  %v382_v23 = vld [vmem:[#allocation4 + $0x8] sm:$0xff] (!%p964_p2)  ;;  %v1244_v36 = vmov (!%p964_p2), 1.0|1.0  }
  0x36   : > { %1060 = vmatprep.subr.bf16.mxu1 (!%p964_p2), %v1242_v10  ;;  %1017 = vmatprep.subr.bf16.mxu0 (!%p964_p2), %v1242_v10  ;;  %v364_v17 = vsub.s32 (!%p964_p2), %v361_v16, %v363_v14  ;;  %v1150_v24 = vld [vmem:[%s1349_s9 + $0x20] sm:$0xff] (!%p964_p2)   ;;  %v386_v28 = vld [vmem:[#allocation4 + $0x28] sm:$0xff] (!%p964_p2)  ;;  %v1152_v34 = vld [vmem:[%s1349_s9 + $0x30] sm:$0xff] (!%p964_p2)   ;;  %vm529_vm13 = vcmask (!%p964_p2), 195584  }
  0x37   : > { %1035 = vmatprep.mubr.msk.bf16.mxu1 (!%p964_p2), %vm1243_vm2, %v1242_v10  ;;  %1031 = vmatprep.mubr.msk.bf16.mxu0 (!%p964_p2), %vm1243_vm2, %v1242_v10  ;;  %v389_v15 = vsub.s32 (!%p964_p2), 0, %v388_v12  ;;  %v385_v27 = vld [vmem:[#allocation4 + $0x20] sm:$0xff] (!%p964_p2)  ;;  %v1151_v31 = vld [vmem:[%s1349_s9 + $0x28] sm:$0xff] (!%p964_p2)   ;;  %v1153_v35 = vld [vmem:[%s1349_s9 + $0x38] sm:$0xff] (!%p964_p2)  }
  0x38   : > { %v538_v37 = vld [vmem:[#allocation3 + $0x10] sm:$0xff] (!%p964_p2)  ;;  %v536_v38 = vld [vmem:[#allocation3] sm:$0xff] (!%p964_p2)  ;;  %v539_v43 = vld [vmem:[#allocation3 + $0x18] sm:$0xff] (!%p964_p2) }
  0x39   : > { %1068 = vmatpush3.bf16.msra.mxu1 (!%p964_p2), %v1147_v11  ;;  %1018 = vmatpush3.bf16.msra.mxu0 (!%p964_p2), %v1147_v11  ;;  %v390_v21 = vrot.slane (!%p964_p2), %v364_v17, %v389_v15  ;;  %v537_v44 = vld [vmem:[#allocation3 + $0x8] sm:$0xff] (!%p964_p2)  ;;  %v540_v50 = vld [vmem:[#allocation3 + $0x20] sm:$0xff] (!%p964_p2)  ;;  %v412_v56 = vld [vmem:[#allocation2] sm:$0xff] (!%p964_p2) }
  0x3a   : > { %1061 = vmatprep.subr.bf16.mxu1 (!%p964_p2), %v1242_v10  ;;  %1019 = vmatprep.subr.bf16.mxu0 (!%p964_p2), %v1242_v10  ;;  %v541_v49 = vld [vmem:[#allocation3 + $0x28] sm:$0xff] (!%p964_p2)  ;;  %v414_v55 = vld [vmem:[#allocation2 + $0x10] sm:$0xff] (!%p964_p2)  ;;  %v413_v60 = vld [vmem:[#allocation2 + $0x8] sm:$0xff] (!%p964_p2) }
  0x3b   : > { %vm393_vm3 = vcmp.eq.s32.totalorder %v383_v19, %v390_v21  ;;  %vm391_vm4 = vcmp.eq.s32.totalorder %v381_v20, %v390_v21  ;;  %vm394_vm5 = vcmp.eq.s32.totalorder %v384_v22, %v390_v21  ;;  %vm392_vm6 = vcmp.eq.s32.totalorder %v382_v23, %v390_v21  ;;  %v415_v58 = vld [vmem:[#allocation2 + $0x18] sm:$0xff]  ;;  %v416_v7 = vld [vmem:[#allocation2 + $0x20] sm:$0xff]  ;;  %v417_v9 = vld [vmem:[#allocation2 + $0x28] sm:$0xff] }
  0x3c   : > { %v544_v25 = vsel %vm393_vm3, 1.0, %v1242_v10  ;;  %v542_v26 = vsel %vm391_vm4, 1.0, %v1242_v10  ;;  %v545_v29 = vsel %vm394_vm5, 1.0, %v1242_v10  ;;  %v543_v30 = vsel %vm392_vm6, 1.0, %v1242_v10  ;;  %vm981_vm9 = vmpackc.low %vm394_vm5, %vm393_vm3 }
  0x3d   : > { %1069 = vmatpush3.bf16.msra.mxu1 %v1148_v13  ;;  %1020 = vmatpush3.bf16.msra.mxu0 %v1148_v13  ;;  %vm395_vm7 = vcmp.eq.s32.totalorder %v385_v27, %v390_v21  ;;  %vm396_vm8 = vcmp.eq.s32.totalorder %v386_v28, %v390_v21  ;;  %vm979_vm10 = vmpackc.low %vm392_vm6, %vm391_vm4 }
  0x3e   : > { %1062 = vmatprep.subr.bf16.mxu1 %v1242_v10  ;;  %1021 = vmatprep.subr.bf16.mxu0 %v1242_v10  ;;  %v547_v32 = vsel %vm396_vm8, 1.0, %v1242_v10  ;;  %v546_v33 = vsel %vm395_vm7, 1.0, %v1242_v10  ;;  %vm983_vm11 = vmpackc.low %vm396_vm8, %vm395_vm7 }
  0x3f   : > { %552 = vadd.xlane.f32.xlu1 %v544_v25  ;;  %548 = vadd.xlane.f32.xlu0 %v542_v26 }
  0x41   : > { %1070 = vmatpush3.bf16.msra.mxu1 %v1149_v18  ;;  %1022 = vmatpush3.bf16.msra.mxu0 %v1149_v18 }
  0x42   : > { %1063 = vmatprep.subr.bf16.mxu1 %v1242_v10  ;;  %1023 = vmatprep.subr.bf16.mxu0 %v1242_v10 }
  0x43   : > { %554 = vadd.xlane.f32.xlu1 %v545_v29  ;;  %550 = vadd.xlane.f32.xlu0 %v543_v30 }
  0x45   : > { %1071 = vmatpush3.bf16.msra.mxu1 %v1150_v24  ;;  %1024 = vmatpush3.bf16.msra.mxu0 %v1150_v24 }
  0x46   : > { %1064 = vmatprep.subr.bf16.mxu1 %v1242_v10  ;;  %1025 = vmatprep.subr.bf16.mxu0 %v1242_v10 }
  0x47   : > { %558 = vadd.xlane.f32.xlu1 %v547_v32  ;;  %556 = vadd.xlane.f32.xlu0 %v546_v33 }
  0x49   : > { %1072 = vmatpush3.bf16.msra.mxu1 %v1151_v31  ;;  %1026 = vmatpush3.bf16.msra.mxu0 %v1151_v31 }
  0x4a   : > { %1065 = vmatprep.subr.bf16.mxu1 %v1242_v10  ;;  %1027 = vmatprep.subr.bf16.mxu0 %v1242_v10 }
  0x4d   : > { %1073 = vmatpush3.bf16.msra.mxu1 %v1152_v34  ;;  %1028 = vmatpush3.bf16.msra.mxu0 %v1152_v34 }
  0x4e   : > { %1066 = vmatprep.subr.bf16.mxu1 %v1242_v10  ;;  %1029 = vmatprep.subr.bf16.mxu0 %v1242_v10 }
  0x51   : > { %1074 = vmatpush3.bf16.msra.mxu1 %v1153_v35  ;;  %1030 = vmatpush3.bf16.msra.mxu0 %v1153_v35 }
  0x54   : > { %1036 = vmatmul.mubr.msk.bf16.vlgmr.msra.gmra.mrb[0].mxu1 %vm981_vm9, %v1244_v36  ;;  %1032 = vmatmul.mubr.msk.bf16.vlgmr.msra.gmra.mrb[0].mxu0 %vm979_vm10, %v1244_v36 }
  0x55   : > { %1039 = vmatprep.mubr.msk.bf16.mxu1 %vm1243_vm2, %v1242_v10 }
  0x5c   : > { %1040 = vmatmul.mubr.msk.bf16.gmra.mrb[4].mxu1 %vm983_vm11, %v1244_v36 }
  0xcc   : > { %v553_v39 = vpop.xlane.xlu1 %552  ;;  %v549_v40 = vpop.xlane.xlu0 %548 }
  0xcd   : > { %v562_v41 = vadd.f32 %v553_v39, %v538_v37  ;;  %v560_v42 = vadd.f32 %v549_v40, %v536_v38 }
  0xcf   : > { %569 = vst.msk [vmem:[#allocation3 + $0x10] sm:$0xff] %vm566_vm12, %v562_v41  ;;  %567 = vst.msk [vmem:[#allocation3] sm:$0xff] %vm566_vm12, %v560_v42 }
  0xd0   : > { %v555_v45 = vpop.xlane.xlu1 %554  ;;  %v551_v46 = vpop.xlane.xlu0 %550 }
  0xd1   : > { %v563_v47 = vadd.f32 %v555_v45, %v539_v43  ;;  %v561_v48 = vadd.f32 %v551_v46, %v537_v44 }
  0xd3   : > { %570 = vst.msk [vmem:[#allocation3 + $0x18] sm:$0xff] %vm566_vm12, %v563_v47  ;;  %568 = vst.msk [vmem:[#allocation3 + $0x8] sm:$0xff] %vm566_vm12, %v561_v48 }
  0xd4   : > { %v559_v51 = vpop.xlane.xlu1 %558  ;;  %v557_v52 = vpop.xlane.xlu0 %556 }
  0xd5   : > { %v565_v53 = vadd.f32 %v559_v51, %v541_v49  ;;  %v564_v54 = vadd.f32 %v557_v52, %v540_v50 }
  0xd7   : > { %572 = vst.msk [vmem:[#allocation3 + $0x28] sm:$0xff] %vm566_vm12, %v565_v53  ;;  %571 = vst.msk [vmem:[#allocation3 + $0x20] sm:$0xff] %vm566_vm12, %v564_v54 }
 0x127   : > { %v508_v57 = vpop.f32.mrb[0].mxu1  ;;  %v500_v59 = vpop.f32.mrb[0].mxu0 }
 0x128   : > { %v525_v61 = vadd.f32 %v508_v57, %v414_v55  ;;  %v1037_v62 = vpop.f32.mrb[1].mxu1  ;;  %v523_v63 = vadd.f32 %v500_v59, %v412_v56  ;;  %v1033_v0 = vpop.f32.mrb[1].mxu0 }
 0x129   : > { %v511_v1 = vpop.f32.mrb[2].mxu1  ;;  %v503_v2 = vpop.f32.mrb[2].mxu0 }
 0x12a   : > { %532 = vst.msk [vmem:[#allocation2 + $0x10] sm:$0xff] %vm529_vm13, %v525_v61  ;;  %v526_v3 = vadd.f32 %v511_v1, %v415_v58  ;;  %v1038_v4 = vpop.f32.mrb[3].mxu1  ;;  %530 = vst.msk [vmem:[#allocation2] sm:$0xff] %vm529_vm13, %v523_v63  ;;  %v524_v5 = vadd.f32 %v503_v2, %v413_v60  ;;  %v1034_v6 = vpop.f32.mrb[3].mxu0 }
 0x12c   : > { %533 = vst.msk [vmem:[#allocation2 + $0x18] sm:$0xff] %vm529_vm13, %v526_v3  ;;  %531 = vst.msk [vmem:[#allocation2 + $0x8] sm:$0xff] %vm529_vm13, %v524_v5 }
 0x12f   : > { %v516_v8 = vpop.f32.mrb[4].mxu1 }
 0x130   : > { %v527_v10 = vadd.f32 %v516_v8, %v416_v7  ;;  %v1041_v11 = vpop.f32.mrb[5].mxu1 }
 0x131   : > { %v519_v12 = vpop.f32.mrb[6].mxu1 }
 0x132   : > { %534 = vst.msk [vmem:[#allocation2 + $0x20] sm:$0xff] %vm529_vm13, %v527_v10  ;;  %v528_v13 = vadd.f32 %v519_v12, %v417_v9  ;;  %v1042_v14 = vpop.f32.mrb[7].mxu1 }
 0x134   : > { %535 = vst.msk [vmem:[#allocation2 + $0x28] sm:$0xff] %vm529_vm13, %v528_v13 }
 0x135 PF: > { %p985_p3 = scmp.ne.s32.totalorder %s1214_s23, 2 }
 0x136   : > { %v579_v15 = vld [vmem:[#allocation3 + $0x10] sm:$0xff] (!%p985_p3)  ;;  %v577_v16 = vld [vmem:[#allocation3] sm:$0xff] (!%p985_p3)  ;;  %v580_v17 = vld [vmem:[#allocation3 + $0x18] sm:$0xff] (!%p985_p3)  ;;  %v1245_v18 = vmov (!%p985_p3), 0   ;;  %v1246_v32 = vmov (!%p985_p3), 0.0   ;;  %vm662_vm14 = vcmask (!%p985_p3), 1043456  }
 0x137   : > { %576 = sbr.rel (%p985_p3) target bundleno = 833 (0x341), region = 44  ;;  %1155 = vset.pattern.permute.xlu1 (!%p985_p3), %v1245_v18  ;;  %1154 = vset.pattern.permute.xlu0 (!%p985_p3), %v1245_v18  ;;  %v585_v19 = vmax.f32 (!%p985_p3), %v579_v15, 1.0  ;;  %v583_v20 = vmax.f32 (!%p985_p3), %v577_v16, 1.0  ;;  %v586_v21 = vmax.f32 (!%p985_p3), %v580_v17, 1.0  ;;  %v578_v22 = vld [vmem:[#allocation3 + $0x8] sm:$0xff] (!%p985_p3)  ;;  %v581_v24 = vld [vmem:[#allocation3 + $0x20] sm:$0xff] (!%p985_p3) }
 0x138   : > { %v584_v23 = vmax.f32 (!%p985_p3), %v578_v22, 1.0  ;;  %v582_v25 = vld [vmem:[#allocation3 + $0x28] sm:$0xff] (!%p985_p3)  ;;  %v587_v26 = vmax.f32 (!%p985_p3), %v581_v24, 1.0  ;;  %v1156_v30 = vld [vmem:[%s1344_s20] sm:$0xff] (!%p985_p3)   ;;  %1043 = vmatprep.subr.bf16.mxu0 (!%p985_p3), %v1246_v32  ;;  %1075 = vmatprep.subr.bf16.mxu1 (!%p985_p3), %v1246_v32  ;;  %v1157_v34 = vld [vmem:[%s1344_s20 + $0x8] ss:$0 sps:$4 sm:$0xff] (!%p985_p3)  }
 0x139   : > { %1158 = vrcp.f32 (!%p985_p3), %v585_v19  ;;  %v588_v27 = vmax.f32 (!%p985_p3), %v582_v25, 1.0  ;;  %1044 = vmatpush3.bf16.msra.mxu0 (!%p985_p3), %v1156_v30  ;;  %1077 = vmatpush3.bf16.msra.mxu1 (!%p985_p3), %v1156_v30  ;;  %v664_v36 = vsel (!%p985_p3), %vm662_vm14, %v1157_v34, 0  ;;  %vm1247_vm15 = vmmov (!%p985_p3), 0   ;;  %v597_v40 = vld [vmem:[#allocation2 + $0x10] sm:$0xff] (!%p985_p3)  ;;  %v598_v41 = vld [vmem:[#allocation2 + $0x18] sm:$0xff] (!%p985_p3)  ;;  %v595_v42 = vld [vmem:[#allocation2] sm:$0xff] (!%p985_p3) }
 0x13a   : > { %1160 = vrcp.f32 (!%p985_p3), %v583_v20  ;;  %1045 = vmatprep.subr.bf16.mxu0 (!%p985_p3), %v1246_v32  ;;  %1076 = vmatprep.subr.bf16.mxu1 (!%p985_p3), %v1246_v32  ;;  %v596_v43 = vld [vmem:[#allocation2 + $0x8] sm:$0xff] (!%p985_p3)  ;;  %vm652_vm0 = vcmask (!%p985_p3), 195584   ;;  %v599_v52 = vld [vmem:[#allocation2 + $0x20] sm:$0xff] (!%p985_p3)  ;;  %vm723_vm1 = vcmask (!%p985_p3), 261120   ;;  %vm772_vm2 = vcmask (!%p985_p3), 7168  }
 0x13b   : > { %1162 = vrcp.f32 (!%p985_p3), %v586_v21  ;;  %1047 = vmatprep.mubr.msk.bf16.mxu0 (!%p985_p3), %vm1247_vm15, %v1246_v32  ;;  %1051 = vmatprep.mubr.msk.bf16.mxu1 (!%p985_p3), %vm1247_vm15, %v1246_v32  ;;  %v600_v54 = vld [vmem:[#allocation2 + $0x28] sm:$0xff] (!%p985_p3) }
 0x13c   : > { %1164 = vrcp.f32 (!%p985_p3), %v584_v23 }
 0x13d   : > { %1166 = vrcp.f32 (!%p985_p3), %v587_v26  ;;  %1046 = vmatpush3.bf16.msra.mxu0 (!%p985_p3), %v664_v36  ;;  %1078 = vmatpush3.bf16.msra.mxu1 (!%p985_p3), %v664_v36 }
 0x13e   : > { %1168 = vrcp.f32 %v588_v27 }
 0x143   : > { %v1159_v28 = vpop.eup %1158 }
 0x144   : > { %v1161_v29 = vpop.eup %1160  ;;  %613 = vperm.xlu0 %1154, %v1159_v28  }
 0x145   : > { %v1163_v31 = vpop.eup %1162  ;;  %603 = vperm.xlu1 %1155, %v1161_v29  }
 0x146   : > { %v1165_v33 = vpop.eup %1164 }
 0x147   : > { %v1167_v35 = vpop.eup %1166 }
 0x148   : > { %618 = vperm.xlu0 %1154, %v1163_v31   ;;  %v1169_v37 = vpop.eup %1168 }
 0x149   : > { %608 = vperm.xlu1 %1155, %v1165_v33  }
 0x14c   : > { %623 = vperm.xlu0 %1154, %v1167_v35  }
 0x14d   : > { %628 = vperm.xlu1 %1155, %v1169_v37  }
 0x1c3   : > { %v614_v38 = vpop.permute.xlu0 %613 }
 0x1c4   : > { %v604_v39 = vpop.permute.xlu1 %603  ;;  %v633_v45 = vmul.f32 %v614_v38, %v597_v40 }
 0x1c5   : > { %v631_v48 = vmul.f32 %v604_v39, %v595_v42 }
 0x1c7   : > { %v619_v44 = vpop.permute.xlu0 %618 }
 0x1c8   : > { %v634_v46 = vmul.f32 %v619_v44, %v598_v41  ;;  %v609_v47 = vpop.permute.xlu1 %608 }
 0x1c9   : > { %v632_v49 = vmul.f32 %v609_v47, %v596_v43 }
 0x1ca   : > { %v638_v50 = vpack.c.bf16 %v634_v46, %v633_v45 }
 0x1cb   : > { %v637_v51 = vpack.c.bf16 %v632_v49, %v631_v48  ;;  %v624_v53 = vpop.permute.xlu0 %623 }
 0x1cc   : > { %v629_v55 = vpop.permute.xlu1 %628  ;;  %1052 = vmatmul.mubr.msk.bf16.vlgmr.msra.gmra.mrb[0].mxu1 %vm652_vm0, %v638_v50  ;;  %v635_v56 = vmul.f32 %v624_v53, %v599_v52 }
 0x1cd   : > { %1048 = vmatmul.mubr.msk.bf16.vlgmr.msra.gmra.mrb[0].mxu0 %vm652_vm0, %v637_v51  ;;  %1055 = vmatprep.mubr.msk.bf16.mxu1 %vm1247_vm15, %v1246_v32  ;;  %v636_v57 = vmul.f32 %v629_v55, %v600_v54 }
 0x1cf   : > { %v639_v58 = vpack.c.bf16 %v636_v57, %v635_v56 }
 0x1d4   : > { %1056 = vmatmul.mubr.msk.bf16.gmra.mrb[4].mxu1 %vm652_vm0, %v639_v58 }
 0x29f   : > { %v708_v59 = vpop.f32.mrb[0].mxu1 }
 0x2a0   : > { %v700_v60 = vpop.f32.mrb[0].mxu0  ;;  %726 = vst.msk [vmem:[%s1354_s8 + $0x10] sm:$0xff] %vm723_vm1, %v708_v59  ;;  %v1053_v61 = vpop.f32.mrb[1].mxu1  ;;  %v732_v3 = vand.u32 2147483647, %v708_v59 }
 0x2a1   : > { %724 = vst.msk [vmem:[%s1354_s8] sm:$0xff] %vm723_vm1, %v700_v60  ;;  %v730_v62 = vand.u32 2147483647, %v700_v60  ;;  %v1049_v63 = vpop.f32.mrb[1].mxu0  ;;  %v711_v0 = vpop.f32.mrb[2].mxu1 }
 0x2a2   : > { %v703_v1 = vpop.f32.mrb[2].mxu0  ;;  %727 = vst.msk [vmem:[%s1354_s8 + $0x18] sm:$0xff] %vm723_vm1, %v711_v0  ;;  %v1054_v2 = vpop.f32.mrb[3].mxu1  ;;  %v733_v8 = vand.u32 2147483647, %v711_v0  ;;  %v742_v9 = vsel %vm723_vm1, %v732_v3, -inf }
 0x2a3   : > { %725 = vst.msk [vmem:[%s1354_s8 + $0x8] sm:$0xff] %vm723_vm1, %v703_v1  ;;  %v731_v4 = vand.u32 2147483647, %v703_v1  ;;  %v1050_v5 = vpop.f32.mrb[3].mxu0  ;;  %v736_v6 = vsel %vm723_vm1, %v730_v62, -inf }
 0x2a4   : > { %737 = vmax.xlane.f32.xlu0 %v736_v6  ;;  %v745_v17 = vsel %vm723_vm1, %v733_v8, -inf }
 0x2a5   : > { %v739_v7 = vsel %vm723_vm1, %v731_v4, -inf }
 0x2a6   : > { %740 = vmax.xlane.f32.xlu1 %v739_v7 }
 0x2a7   : > { %v716_v10 = vpop.f32.mrb[4].mxu1 }
 0x2a8   : > { %743 = vmax.xlane.f32.xlu0 %v742_v9  ;;  %728 = vst.msk [vmem:[%s1354_s8 + $0x20] sm:$0xff] %vm723_vm1, %v716_v10  ;;  %v734_v11 = vand.u32 2147483647, %v716_v10  ;;  %v1057_v12 = vpop.f32.mrb[5].mxu1 }
 0x2a9   : > { %v719_v13 = vpop.f32.mrb[6].mxu1 }
 0x2aa   : > { %729 = vst.msk [vmem:[%s1354_s8 + $0x28] sm:$0xff] %vm723_vm1, %v719_v13  ;;  %v1058_v14 = vpop.f32.mrb[7].mxu1  ;;  %v748_v15 = vsel %vm723_vm1, %v734_v11, -inf  ;;  %v735_v16 = vand.u32 2147483647, %v719_v13 }
 0x2ab   : > { %749 = vmax.xlane.f32.xlu1 %v748_v15 }
 0x2ac   : > { %746 = vmax.xlane.f32.xlu0 %v745_v17  ;;  %v751_v18 = vsel %vm723_vm1, %v735_v16, -inf }
 0x2b0   : > { %752 = vmax.xlane.f32.xlu0 %v751_v18 }
 0x331   : > { %v738_v19 = vpop.xlane.xlu0 %737 }
 0x332   : > { %vm754_vm3 = vcmp.gt.f32.partialorder %v738_v19, 0.0 }
 0x333   : > { %v991_v20 = vsel %vm754_vm3, 1.0, %v1246_v32  ;;  %v741_v21 = vpop.xlane.xlu1 %740 }
 0x334   : > { %773 = vst.msk [vmem:[%s1359_s19] sm:$0xff] %vm772_vm2, %v991_v20  ;;  %vm755_vm4 = vcmp.gt.f32.partialorder %v741_v21, 0.0 }
 0x335   : > { %v992_v22 = vsel %vm755_vm4, 1.0, %v1246_v32  ;;  %v744_v23 = vpop.xlane.xlu0 %743 }
 0x336   : > { %774 = vst.msk [vmem:[%s1359_s19 + $0x8] sm:$0xff] %vm772_vm2, %v992_v22  ;;  %vm756_vm5 = vcmp.gt.f32.partialorder %v744_v23, 0.0 }
 0x337   : > { %v993_v24 = vsel %vm756_vm5, 1.0, %v1246_v32 }
 0x338   : > { %775 = vst.msk [vmem:[%s1359_s19 + $0x10] sm:$0xff] %vm772_vm2, %v993_v24  ;;  %v750_v25 = vpop.xlane.xlu1 %749 }
 0x339   : > { %v747_v26 = vpop.xlane.xlu0 %746  ;;  %vm758_vm6 = vcmp.gt.f32.partialorder %v750_v25, 0.0 }
 0x33a   : > { %vm757_vm7 = vcmp.gt.f32.partialorder %v747_v26, 0.0  ;;  %v995_v27 = vsel %vm758_vm6, 1.0, %v1246_v32 }
 0x33b   : > { %v994_v28 = vsel %vm757_vm7, 1.0, %v1246_v32  ;;  %777 = vst.msk [vmem:[%s1359_s19 + $0x20] sm:$0xff] %vm772_vm2, %v995_v27 }
 0x33c   : > { %776 = vst.msk [vmem:[%s1359_s19 + $0x18] sm:$0xff] %vm772_vm2, %v994_v28 }
 0x33d   : > { %v753_v29 = vpop.xlane.xlu0 %752 }
 0x33e   : > { %vm759_vm8 = vcmp.gt.f32.partialorder %v753_v29, 0.0 }
 0x33f   : > { %v996_v30 = vsel %vm759_vm8, 1.0, %v1246_v32 }
 0x340   : > { %778 = vst.msk [vmem:[%s1359_s19 + $0x28] sm:$0xff] %vm772_vm2, %v996_v30 }
 0x341 PF: > { %s22_s28 = sadd.s32 1, %s1238_s28   ;;  %s1510_s11 = sld [smem:[#allocation8_spill]] }
 0x342   : > { %p19_p4 = scmp.ge.s32.totalorder %s22_s28, 14   ;;  %s1511_s12 = sld [smem:[#allocation9_spill]] }
 0x343   : > { %s1512_s13 = sld [smem:[#allocation10_spill]]  ;;  %s1513_s23 = smov %s1226_s0 }
 0x344   : > { %s1514_s24 = smov %s1230_s26  ;;  %s1515_s25 = smov %s1234_s27 }
 0x345   :  { %21 = sbr.rel (!%p19_p4) target bundleno = 19 (0x13), region = 92 }
 0x347   : > { %s1516_s0 = smov %s1510_s11 }
 0x348   : > { %s1517_s26 = smov %s1511_s12 }
 0x349   : > { %s1518_s27 = smov %s1512_s13 }

</bundles_post_ra>
